<compile_context>
chip_gen: v7x
topology: tpu7x:2x2x1
jax: 0.10.0
libtpu: 0.0.40
codegen_flags: <defaults>
</compile_context>

<pallas_src>
import math

import jax
import jax.numpy as jnp
from jax import lax
from jax.experimental import pallas as pl
from jax.experimental.pallas import tpu as pltpu


# ----------------------------------------------------------------------------
# Fused Resblock kernel (one grid step == one batch sample)
# ----------------------------------------------------------------------------
def _make_resblock_kernel(has_shortcut: bool, L: int, cdtype):
    Lm = L // 3

    def kernel(x_ref, w1_ref, b1_ref, w2_ref, b2_ref, *rest):
        if has_shortcut:
            wsc_ref, bsc_ref, o_ref, zt_ref = rest
        else:
            o_ref, zt_ref = rest

        x = x_ref[...].astype(jnp.float32)                       # (Cin, L)

        # In-kernel conv boundary masks (zero padding at the sample edges).
        col = lax.broadcasted_iota(jnp.int32, (1, L), 1)
        not_first = col > 0
        not_last = col < (L - 1)

        def conv3_bn(inp, w_ref, b_ref):
            # out[:, p] = W0 @ inp[:, p-1] + W1 @ inp[:, p] + W2 @ inp[:, p+1]
            # Fused: stack the three lane-shifted taps and do ONE matmul against
            # the host-concatenated (Cout, 3*C) weight (BN scale already folded).
            left = jnp.where(not_first, pltpu.roll(inp, 1, axis=1), 0.0)
            right = jnp.where(not_last, pltpu.roll(inp, L - 1, axis=1), 0.0)
            stacked = jnp.concatenate([left, inp, right], axis=0)   # (3*C, L) f32
            y = jnp.dot(w_ref[...], stacked.astype(cdtype),
                        preferred_element_type=jnp.float32)
            return y + b_ref[...]                                    # folded-BN bias

        # Left branch: conv1 + BN + LeakyReLU (+ Dropout -> identity in eval).
        a = conv3_bn(x, w1_ref, b1_ref)
        a = jnp.where(a >= 0, a, 0.01 * a)
        # conv2 + BN.
        b = conv3_bn(a, w2_ref, b2_ref)

        # Shortcut: 1x1 conv + BN (projection) or identity (exact, stays f32).
        if has_shortcut:
            s = jnp.dot(wsc_ref[...], x.astype(cdtype),
                        preferred_element_type=jnp.float32) + bsc_ref[...]
        else:
            s = x

        # Residual add + LeakyReLU (all f32 on the VPU).
        z = b + s
        z = jnp.where(z >= 0, z, 0.01 * z)                          # (Cout, L)

        # MaxPool1d(kernel=3, stride=3): put positions on the sublane axis, pull
        # the three pooling phases with sublane-strided reads (last-dim stride
        # stays 1), and reduce with an elementwise max.  No selection matmul.
        zt_ref[...] = jnp.transpose(z, (1, 0))                      # (L, Cout)
        p0 = zt_ref[pl.ds(0, Lm, stride=3), :]
        p1 = zt_ref[pl.ds(1, Lm, stride=3), :]
        p2 = zt_ref[pl.ds(2, Lm, stride=3), :]
        pooled_t = jnp.maximum(jnp.maximum(p0, p1), p2)             # (Lm, Cout)
        o_ref[...] = jnp.transpose(pooled_t, (1, 0)).astype(o_ref.dtype)

    return kernel


# ----------------------------------------------------------------------------
# Host-side helpers
# ----------------------------------------------------------------------------
def _default_compute_dtype():
    """bf16 MXU operands on bf16-native chips (v6e/v7x); f32 elsewhere (v5e)."""
    try:
        kind = jax.devices()[0].device_kind.lower()
    except Exception:
        return jnp.float32
    if "v6" in kind or "v7" in kind:
        return jnp.bfloat16
    return jnp.float32


def _fold_conv3(w, scale):
    """(Cout, Cin, 3) conv weight * folded-BN scale -> stacked (Cout, 3*Cin).

    Column blocks are tap-major: [W(:,:,0) | W(:,:,1) | W(:,:,2)], matching the
    in-kernel row stacking [left; center; right]."""
    cout, cin, k = w.shape
    w = w * scale[:, None, None]
    return jnp.transpose(w, (0, 2, 1)).reshape(cout, k * cin)


def _vmem_limit_bytes(Cin, Cout, L):
    Lm = L // 3
    pad8 = lambda c: max(8, -(-c // 8) * 8)
    est = 4 * (2 * pad8(Cin) * L + 2 * pad8(Cout) * Lm)   # double-buffered I/O blocks
    est += 4 * L * 128                                     # (L, Cout) pooling scratch (lane-padded)
    est += 4 * 12 * pad8(max(Cin, Cout)) * L               # in-flight temporaries (rough)
    est += 2 << 20                                         # weights + compiler headroom
    # Sized for v7x's 64 MiB physical / ~32 MiB default scoped VMEM.
    return int(min(max(est, 16 << 20), 48 << 20))


def resblock_forward(params, x, compute_dtype=None):
    """Eval-mode Resblock forward.  x: (N, Cin, L) float32, L % 3 == 0.

    For lane-dense output stores, L/3 should be a multiple of 128 (the demo
    uses L=384 -> pooled width 128)."""
    N, Cin, L = x.shape
    if L % 3 != 0:
        raise ValueError("fused Resblock kernel requires L % 3 == 0")
    Cout = params["w1"].shape[0]
    Lm = L // 3
    cdtype = jnp.dtype(compute_dtype if compute_dtype is not None
                       else _default_compute_dtype())

    # Fold BN scale into the conv weights off the hot path; stack the K=3 taps.
    w1 = _fold_conv3(params["w1"], params["s1"]).astype(cdtype)     # (Cout, 3*Cin)
    b1 = params["b1"].reshape(Cout, 1).astype(jnp.float32)
    w2 = _fold_conv3(params["w2"], params["s2"]).astype(cdtype)     # (Cout, 3*Cout)
    b2 = params["b2"].reshape(Cout, 1).astype(jnp.float32)

    def const_spec(shape):
        return pl.BlockSpec(shape, lambda n: (0,) * len(shape))

    has_sc = "wsc" in params
    args = [x, w1, b1, w2, b2]
    in_specs = [
        pl.BlockSpec((None, Cin, L), lambda n: (n, 0, 0)),   # one sample per grid step
        const_spec((Cout, 3 * Cin)),
        const_spec((Cout, 1)),
        const_spec((Cout, 3 * Cout)),
        const_spec((Cout, 1)),
    ]
    if has_sc:
        wsc = (params["wsc"][:, :, 0] * params["ssc"][:, None]).astype(cdtype)
        bsc = params["bsc"].reshape(Cout, 1).astype(jnp.float32)
        args += [wsc, bsc]
        in_specs += [const_spec((Cout, Cin)), const_spec((Cout, 1))]

    return pl.pallas_call(
        _make_resblock_kernel(has_sc, L, cdtype),
        out_shape=jax.ShapeDtypeStruct((N, Cout, Lm), x.dtype),
        grid=(N,),
        in_specs=in_specs,
        out_specs=pl.BlockSpec((None, Cout, Lm), lambda n: (n, 0, 0)),
        scratch_shapes=[pltpu.VMEM((L, Cout), jnp.float32)],
        compiler_params=pltpu.CompilerParams(
            dimension_semantics=("parallel",),
            vmem_limit_bytes=_vmem_limit_bytes(Cin, Cout, L)),
    )(*args)


# ----------------------------------------------------------------------------
# Parameter init (deterministic, synthetic; BN running stats folded)
# ----------------------------------------------------------------------------
def _init_conv(key, cout, cin, k):
    bound = 1.0 / math.sqrt(cin * k)
    return jax.random.uniform(key, (cout, cin, k), jnp.float32, -bound, bound)


def _init_bn_folded(key, c, eps=1e-5):
    k1, k2, k3, k4 = jax.random.split(key, 4)
    gamma = 1.0 + 0.1 * jax.random.normal(k1, (c,), jnp.float32)
    beta = 0.1 * jax.random.normal(k2, (c,), jnp.float32)
    mean = 0.1 * jax.random.normal(k3, (c,), jnp.float32)
    var = 1.0 + 0.1 * jax.random.uniform(k4, (c,), jnp.float32)
    scale = gamma / jnp.sqrt(var + eps)
    bias = beta - mean * scale
    return scale, bias


def init_resblock(key, inchannel, outchannel):
    k1, k2, k3, k4, k5, k6 = jax.random.split(key, 6)
    p = {
        "w1": _init_conv(k1, outchannel, inchannel, 3),
        "w2": _init_conv(k3, outchannel, outchannel, 3),
    }
    p["s1"], p["b1"] = _init_bn_folded(k2, outchannel)
    p["s2"], p["b2"] = _init_bn_folded(k4, outchannel)
    if inchannel != outchannel:   # stride==1, kernel==3 -> 1x1 conv + BN shortcut
        p["wsc"] = _init_conv(k5, outchannel, inchannel, 1)
        p["ssc"], p["bsc"] = _init_bn_folded(k6, outchannel)
    return p


# ----------------------------------------------------------------------------
# Pure-JAX reference (lax conv / reduce_window) for validation
# ----------------------------------------------------------------------------
def _conv1d_ref(x, w, stride, padding):
    return lax.conv_general_dilated(
        x, w, (stride,), [(padding, padding)],
        dimension_numbers=("NCH", "OIH", "NCH"),
        precision=lax.Precision.HIGHEST)


def _affine(y, s, b):
    return y * s[None, :, None] + b[None, :, None]


def _leaky(v):
    return jnp.where(v >= 0, v, 0.01 * v)


def resblock_ref(params, x):
    a = _leaky(_affine(_conv1d_ref(x, params["w1"], 1, 1), params["s1"], params["b1"]))
    b = _affine(_conv1d_ref(a, params["w2"], 1, 1), params["s2"], params["b2"])
    if "wsc" in params:
        s = _affine(_conv1d_ref(x, params["wsc"], 1, 0), params["ssc"], params["bsc"])
    else:
        s = x
    z = _leaky(b + s)
    return lax.reduce_window(z, -jnp.inf, lax.max, (1, 1, 3), (1, 1, 3), "VALID")


# ----------------------------------------------------------------------------
if __name__ == "__main__":
    key = jax.random.PRNGKey(0)
    kp1, kx1, kp2, kx2 = jax.random.split(key, 4)

    N, L = 4, 384   # pooled width L//3 = 128 -> lane-dense output stores

    cases = []
    # Case 1: projection shortcut (inchannel != outchannel).
    p1 = init_resblock(kp1, inchannel=4, outchannel=8)
    x1 = jax.random.normal(kx1, (N, 4, L), jnp.float32)
    cases.append((p1, x1, 8))
    # Case 2: identity shortcut (inchannel == outchannel).
    p2 = init_resblock(kp2, inchannel=8, outchannel=8)
    x2 = jax.random.normal(kx2, (N, 8, L), jnp.float32)
    cases.append((p2, x2, 8))

    # Always validate the f32 path tightly; also exercise the bf16 MXU path on
    # bf16-native chips (looser tolerance vs the f32 reference).
    dtype_cases = [(jnp.float32, 1e-3)]
    if jnp.dtype(_default_compute_dtype()) == jnp.dtype(jnp.bfloat16):
        dtype_cases.append((jnp.bfloat16, 1.5e-1))

    for params, x, cout in cases:
        ref = resblock_ref(params, x)
        for dt, tol in dtype_cases:
            out = jax.block_until_ready(resblock_forward(params, x, compute_dtype=dt))
            assert out.shape == ref.shape == (N, cout, L // 3), (out.shape, ref.shape)
            err = float(jnp.max(jnp.abs(out - ref)))
            assert err < tol, (str(dt), err)

    print("KERNEL_OK")
</pallas_src>

<mosaic_0001>
module attributes {stable_mosaic.version = 11 : i64} {
  func.func @kernel(%arg0: i32, %arg1: memref<1x4x384xf32, #tpu.memory_space<vmem>>, %arg2: memref<8x12xf32, #tpu.memory_space<vmem>>, %arg3: memref<8x1xf32, #tpu.memory_space<vmem>>, %arg4: memref<8x24xf32, #tpu.memory_space<vmem>>, %arg5: memref<8x1xf32, #tpu.memory_space<vmem>>, %arg6: memref<8x4xf32, #tpu.memory_space<vmem>>, %arg7: memref<8x1xf32, #tpu.memory_space<vmem>>, %arg8: memref<1x8x128xf32, #tpu.memory_space<vmem>>, %arg9: memref<384x8xf32, #tpu.memory_space<vmem>>) attributes {dimension_semantics = [#tpu.dimension_semantics<parallel>], iteration_bounds = array<i64: 4>, scalar_prefetch = 0 : i64, scratch_operands = 1 : i64, tpu.core_type = #tpu.core_type<tc>, window_params = [{transform_indices = @transform_0, window_bounds = array<i64: 1, 4, 384>}, {pipeline_mode = #tpu.pipeline_mode<synchronous>, transform_indices = @transform_1, window_bounds = array<i64: 8, 12>}, {pipeline_mode = #tpu.pipeline_mode<synchronous>, transform_indices = @transform_2, window_bounds = array<i64: 8, 1>}, {pipeline_mode = #tpu.pipeline_mode<synchronous>, transform_indices = @transform_3, window_bounds = array<i64: 8, 24>}, {pipeline_mode = #tpu.pipeline_mode<synchronous>, transform_indices = @transform_4, window_bounds = array<i64: 8, 1>}, {pipeline_mode = #tpu.pipeline_mode<synchronous>, transform_indices = @transform_5, window_bounds = array<i64: 8, 4>}, {pipeline_mode = #tpu.pipeline_mode<synchronous>, transform_indices = @transform_6, window_bounds = array<i64: 8, 1>}, {transform_indices = @transform_7, window_bounds = array<i64: 1, 8, 128>}]} {
    %c0 = arith.constant 0 : index
    %c0_0 = arith.constant 0 : index
    %c0_1 = arith.constant 0 : index
    %0 = vector.load %arg1[%c0, %c0_0, %c0_1] : memref<1x4x384xf32, #tpu.memory_space<vmem>>, vector<1x4x384xf32>
    %1 = vector.shape_cast %0 : vector<1x4x384xf32> to vector<4x384xf32>
    %2 = tpu.iota {dimensions = array<i32: 1>} : vector<1x384xi32>
    %c0_i32 = arith.constant 0 : i32
    %3 = vector.broadcast %c0_i32 : i32 to vector<1x384xi32>
    %4 = arith.cmpi sgt, %2, %3 : vector<1x384xi32>
    %c383_i32 = arith.constant 383 : i32
    %5 = vector.broadcast %c383_i32 : i32 to vector<1x384xi32>
    %6 = arith.cmpi slt, %2, %5 : vector<1x384xi32>
    %c1_i32 = arith.constant 1 : i32
    %7 = tpu.dynamic_rotate %1 by %c1_i32 dim 1 : vector<4x384xf32>, i32 -> vector<4x384xf32>
    %cst = arith.constant 0.000000e+00 : f32
    %8 = vector.shape_cast %4 : vector<1x384xi1> to vector<1x384xi1>
    %9 = vector.broadcast %8 : vector<1x384xi1> to vector<4x384xi1>
    %10 = vector.broadcast %cst : f32 to vector<4x384xf32>
    %11 = arith.select %9, %7, %10 : vector<4x384xi1>, vector<4x384xf32>
    %c383_i32_2 = arith.constant 383 : i32
    %12 = tpu.dynamic_rotate %1 by %c383_i32_2 dim 1 : vector<4x384xf32>, i32 -> vector<4x384xf32>
    %cst_3 = arith.constant 0.000000e+00 : f32
    %13 = vector.shape_cast %6 : vector<1x384xi1> to vector<1x384xi1>
    %14 = vector.broadcast %13 : vector<1x384xi1> to vector<4x384xi1>
    %15 = vector.broadcast %cst_3 : f32 to vector<4x384xf32>
    %16 = arith.select %14, %12, %15 : vector<4x384xi1>, vector<4x384xf32>
    %17 = tpu.concatenate %11, %1, %16 in 0 : vector<4x384xf32>, vector<4x384xf32>, vector<4x384xf32> -> vector<12x384xf32>
    %c0_4 = arith.constant 0 : index
    %c0_5 = arith.constant 0 : index
    %18 = vector.load %arg2[%c0_4, %c0_5] : memref<8x12xf32, #tpu.memory_space<vmem>>, vector<8x12xf32>
    %cst_6 = arith.constant dense<0.000000e+00> : vector<8x384xf32>
    %19 = tpu.matmul %18, %17, %cst_6 {dimension_numbers = #tpu.dot_dimension_numbers<[1], [0], [0], [1], [0, 0, 1, 1], [], []>} : vector<8x12xf32>, vector<12x384xf32>, vector<8x384xf32> -> vector<8x384xf32>
    %c0_7 = arith.constant 0 : index
    %c0_8 = arith.constant 0 : index
    %20 = vector.load %arg3[%c0_7, %c0_8] : memref<8x1xf32, #tpu.memory_space<vmem>>, vector<8x1xf32>
    %21 = vector.broadcast %20 : vector<8x1xf32> to vector<8x384xf32>
    %22 = arith.addf %19, %21 : vector<8x384xf32>
    %cst_9 = arith.constant 0.000000e+00 : f32
    %23 = vector.broadcast %cst_9 : f32 to vector<8x384xf32>
    %24 = arith.cmpf oge, %22, %23 : vector<8x384xf32>
    %cst_10 = arith.constant 0.00999999977 : f32
    %25 = vector.broadcast %cst_10 : f32 to vector<8x384xf32>
    %26 = arith.mulf %25, %22 : vector<8x384xf32>
    %27 = arith.select %24, %22, %26 : vector<8x384xi1>, vector<8x384xf32>
    %c1_i32_11 = arith.constant 1 : i32
    %28 = tpu.dynamic_rotate %27 by %c1_i32_11 dim 1 : vector<8x384xf32>, i32 -> vector<8x384xf32>
    %cst_12 = arith.constant 0.000000e+00 : f32
    %29 = vector.shape_cast %4 : vector<1x384xi1> to vector<1x384xi1>
    %30 = vector.broadcast %29 : vector<1x384xi1> to vector<8x384xi1>
    %31 = vector.broadcast %cst_12 : f32 to vector<8x384xf32>
    %32 = arith.select %30, %28, %31 : vector<8x384xi1>, vector<8x384xf32>
    %c383_i32_13 = arith.constant 383 : i32
    %33 = tpu.dynamic_rotate %27 by %c383_i32_13 dim 1 : vector<8x384xf32>, i32 -> vector<8x384xf32>
    %cst_14 = arith.constant 0.000000e+00 : f32
    %34 = vector.shape_cast %6 : vector<1x384xi1> to vector<1x384xi1>
    %35 = vector.broadcast %34 : vector<1x384xi1> to vector<8x384xi1>
    %36 = vector.broadcast %cst_14 : f32 to vector<8x384xf32>
    %37 = arith.select %35, %33, %36 : vector<8x384xi1>, vector<8x384xf32>
    %38 = tpu.concatenate %32, %27, %37 in 0 : vector<8x384xf32>, vector<8x384xf32>, vector<8x384xf32> -> vector<24x384xf32>
    %c0_15 = arith.constant 0 : index
    %c0_16 = arith.constant 0 : index
    %39 = vector.load %arg4[%c0_15, %c0_16] : memref<8x24xf32, #tpu.memory_space<vmem>>, vector<8x24xf32>
    %cst_17 = arith.constant dense<0.000000e+00> : vector<8x384xf32>
    %40 = tpu.matmul %39, %38, %cst_17 {dimension_numbers = #tpu.dot_dimension_numbers<[1], [0], [0], [1], [0, 0, 1, 1], [], []>} : vector<8x24xf32>, vector<24x384xf32>, vector<8x384xf32> -> vector<8x384xf32>
    %c0_18 = arith.constant 0 : index
    %c0_19 = arith.constant 0 : index
    %41 = vector.load %arg5[%c0_18, %c0_19] : memref<8x1xf32, #tpu.memory_space<vmem>>, vector<8x1xf32>
    %42 = vector.broadcast %41 : vector<8x1xf32> to vector<8x384xf32>
    %43 = arith.addf %40, %42 : vector<8x384xf32>
    %c0_20 = arith.constant 0 : index
    %c0_21 = arith.constant 0 : index
    %44 = vector.load %arg6[%c0_20, %c0_21] : memref<8x4xf32, #tpu.memory_space<vmem>>, vector<8x4xf32>
    %cst_22 = arith.constant dense<0.000000e+00> : vector<8x384xf32>
    %45 = tpu.matmul %44, %1, %cst_22 {dimension_numbers = #tpu.dot_dimension_numbers<[1], [0], [0], [1], [0, 0, 1, 1], [], []>} : vector<8x4xf32>, vector<4x384xf32>, vector<8x384xf32> -> vector<8x384xf32>
    %c0_23 = arith.constant 0 : index
    %c0_24 = arith.constant 0 : index
    %46 = vector.load %arg7[%c0_23, %c0_24] : memref<8x1xf32, #tpu.memory_space<vmem>>, vector<8x1xf32>
    %47 = vector.broadcast %46 : vector<8x1xf32> to vector<8x384xf32>
    %48 = arith.addf %45, %47 : vector<8x384xf32>
    %49 = arith.addf %43, %48 : vector<8x384xf32>
    %cst_25 = arith.constant 0.000000e+00 : f32
    %50 = vector.broadcast %cst_25 : f32 to vector<8x384xf32>
    %51 = arith.cmpf oge, %49, %50 : vector<8x384xf32>
    %cst_26 = arith.constant 0.00999999977 : f32
    %52 = vector.broadcast %cst_26 : f32 to vector<8x384xf32>
    %53 = arith.mulf %52, %49 : vector<8x384xf32>
    %54 = arith.select %51, %49, %53 : vector<8x384xi1>, vector<8x384xf32>
    %55 = tpu.transpose %54, [1, 0] : vector<8x384xf32> -> vector<384x8xf32>
    %c0_27 = arith.constant 0 : index
    %c0_28 = arith.constant 0 : index
    %56 = vector.load %arg9[%c0_27, %c0_28] : memref<384x8xf32, #tpu.memory_space<vmem>>, vector<384x8xf32>
    tpu.vector_store %arg9[%c0_27, %c0_28], %55 {strides = array<i32>} : memref<384x8xf32, #tpu.memory_space<vmem>>, vector<384x8xf32>,
    %c0_29 = arith.constant 0 : index
    %c0_30 = arith.constant 0 : index
    %57 = tpu.strided_load %arg9[%c0_29, %c0_30] {strides = array<i32: 3, 1>} : memref<384x8xf32, #tpu.memory_space<vmem>>, vector<128x8xf32>
    %c1 = arith.constant 1 : index
    %c0_31 = arith.constant 0 : index
    %58 = tpu.strided_load %arg9[%c1, %c0_31] {strides = array<i32: 3, 1>} : memref<384x8xf32, #tpu.memory_space<vmem>>, vector<128x8xf32>
    %c2 = arith.constant 2 : index
    %c0_32 = arith.constant 0 : index
    %59 = tpu.strided_load %arg9[%c2, %c0_32] {strides = array<i32: 3, 1>} : memref<384x8xf32, #tpu.memory_space<vmem>>, vector<128x8xf32>
    %60 = arith.maximumf %57, %58 : vector<128x8xf32>
    %61 = arith.maximumf %60, %59 : vector<128x8xf32>
    %62 = tpu.transpose %61, [1, 0] : vector<128x8xf32> -> vector<8x128xf32>
    %c0_33 = arith.constant 0 : index
    %c0_34 = arith.constant 0 : index
    %c0_35 = arith.constant 0 : index
    %63 = vector.load %arg8[%c0_33, %c0_34, %c0_35] : memref<1x8x128xf32, #tpu.memory_space<vmem>>, vector<1x8x128xf32>
    %64 = vector.shape_cast %63 : vector<1x8x128xf32> to vector<8x128xf32>
    %65 = vector.shape_cast %62 : vector<8x128xf32> to vector<1x8x128xf32>
    tpu.vector_store %arg8[%c0_33, %c0_34, %c0_35], %65 {strides = array<i32>} : memref<1x8x128xf32, #tpu.memory_space<vmem>>, vector<1x8x128xf32>,
    return
  }
  func.func @transform_0(%arg0: i32) -> (i32, i32, i32) {
    %c0_i32 = arith.constant 0 : i32
    %c0_i32_0 = arith.constant 0 : i32
    %c0_i32_1 = arith.constant 0 : i32
    return %arg0, %c0_i32, %c0_i32_0 : i32, i32, i32
  }
  func.func @transform_1(%arg0: i32) -> (i32, i32) {
    %c0_i32 = arith.constant 0 : i32
    %c0_i32_0 = arith.constant 0 : i32
    %c0_i32_1 = arith.constant 0 : i32
    return %c0_i32, %c0_i32_0 : i32, i32
  }
  func.func @transform_2(%arg0: i32) -> (i32, i32) {
    %c0_i32 = arith.constant 0 : i32
    %c0_i32_0 = arith.constant 0 : i32
    %c0_i32_1 = arith.constant 0 : i32
    return %c0_i32, %c0_i32_0 : i32, i32
  }
  func.func @transform_3(%arg0: i32) -> (i32, i32) {
    %c0_i32 = arith.constant 0 : i32
    %c0_i32_0 = arith.constant 0 : i32
    %c0_i32_1 = arith.constant 0 : i32
    return %c0_i32, %c0_i32_0 : i32, i32
  }
  func.func @transform_4(%arg0: i32) -> (i32, i32) {
    %c0_i32 = arith.constant 0 : i32
    %c0_i32_0 = arith.constant 0 : i32
    %c0_i32_1 = arith.constant 0 : i32
    return %c0_i32, %c0_i32_0 : i32, i32
  }
  func.func @transform_5(%arg0: i32) -> (i32, i32) {
    %c0_i32 = arith.constant 0 : i32
    %c0_i32_0 = arith.constant 0 : i32
    %c0_i32_1 = arith.constant 0 : i32
    return %c0_i32, %c0_i32_0 : i32, i32
  }
  func.func @transform_6(%arg0: i32) -> (i32, i32) {
    %c0_i32 = arith.constant 0 : i32
    %c0_i32_0 = arith.constant 0 : i32
    %c0_i32_1 = arith.constant 0 : i32
    return %c0_i32, %c0_i32_0 : i32, i32
  }
  func.func @transform_7(%arg0: i32) -> (i32, i32, i32) {
    %c0_i32 = arith.constant 0 : i32
    %c0_i32_0 = arith.constant 0 : i32
    %c0_i32_1 = arith.constant 0 : i32
    return %arg0, %c0_i32, %c0_i32_0 : i32, i32, i32
  }
}

</mosaic_0001>

<bundles_post_ra>
// kernel: tpu_custom_call.1
= control target key start
LH: loop header
LB: loop body
LE: loop exit
PB: predicated region body
PF: predicated region fallthrough
CT: control target
= control target key end

     0   :  { %12 = vsyncpa [#allocation4], 0  ;;  %s1879_s0 = inlined_call_operand.hbm [shape: f32[4,4,384], index: 0, kind: input, shape index: {}]   ;;  %s1880_s1 = inlined_call_operand.vmem [shape: f32[8,12], index: 1, kind: input, shape index: {}]   ;;  %s1881_s2 = inlined_call_operand.vmem [shape: f32[8,1], index: 2, kind: input, shape index: {}]   ;;  %s1882_s3 = inlined_call_operand.vmem [shape: f32[8,24], index: 3, kind: input, shape index: {}]   ;;  %s1883_s4 = inlined_call_operand.vmem [shape: f32[8,1], index: 4, kind: input, shape index: {}]   ;;  %s1884_s5 = inlined_call_operand.vmem [shape: f32[8,4], index: 5, kind: input, shape index: {}]   ;;  %s1885_s6 = inlined_call_operand.vmem [shape: f32[8,1], index: 6, kind: input, shape index: {}]   ;;  %s1886_s7 = inlined_call_operand.hbm [shape: f32[4,8,128], index: 7, kind: output, shape index: {}]  }
   0x1   :  { %14 = vsyncpa [#allocation4 + $0x1], 0 }
   0x2   :  { %15 = vsyncpa [#allocation5], 0 }
   0x3   :  { %17 = vsyncpa [#allocation5 + $0x1], 0  ;;  %s1567_s24 = smov 0   ;;  %s1569_s25 = smov 0  }
   0x4   :  { %s1571_s26 = smov 0   ;;  %s1573_s27 = smov 0  }
   0x5 LB: > { %s1588_s28 = sadd.s32 4294967295, %s1516_s27   ;;  %s1262_s29 = sadd.s32 4294967294, %s1516_s27   ;;  %s1516_s27 = sphi %s1573_s27, %s1899_s27   ;;  %s1512_s26 = sphi %s1571_s26, %s1898_s26   ;;  %s1508_s25 = sphi %s1569_s25, %s1897_s25   ;;  %s1504_s24 = sphi %s1567_s24, %s1896_s24  }
   0x6   : > { %s1592_s30 = sadd.s32 1, %s1516_s27   ;;  %s30_s8 = sadd.s32 1, %s1512_s26 }
   0x7   : > { %s27_s9 = ssub.s32 %s1516_s27, %s1592_s30  ;;  %p37_p0 = scmp.ne.s32.totalorder %s1512_s26, %s1508_s25 }
   0x8   : > { %p28_p1 = scmp.eq.s32.totalorder %s27_s9, 0  ;;  %p38_p2 = scmp.eq.s32.totalorder %s1516_s27, 0 }
   0x9   : > { %p43_p3 = scmp.ne.s32.totalorder %s1508_s25, %s1504_s24  ;;  %p44_p4 = scmp.eq.s32.totalorder %s1588_s28, 0 }
   0xa   : > { %s1604_s10 = scalar_select %p28_p1, %s1512_s26, %s30_s8  }
   0xb   : > { %p39_p5 = por %p38_p2, %p37_p0  ;;  %p1606_p6 = por %p44_p4, %p43_p3 }
   0xc   : > { %p193_p7 = scmp.eq.s32.totalorder %s1588_s28, 3  ;;  %p199_p8 = scmp.eq.s32.totalorder %s1262_s29, 3 }
   0xd   : > { %p1359_p9 = scmp.lt.s32.totalorder %s1516_s27, 4  ;;  %s237_s14 = sand.u32 1, %s1512_s26  }
   0xe   : > { %p1612_p10 = por %p193_p7, %p37_p0  ;;  %p1616_p11 = por %p199_p8, %p43_p3 }
   0xf   : > { %s1345_s15 = smul.u32 192, %s1516_s27  ;;  %p1627_p12 = pnand %p1359_p9, %p39_p5 }
  0x10   : > { %s1889_s12 = scalar_select %p1612_p10, 1, 0 }
  0x11   : > { %s1890_s13 = scalar_select %p1616_p11, 1, 0 }
  0x12   : > { %s1344_s16 = smul.u32 12, %s237_s14  ;;  %s1625_s19 = scalar_lea.hbm %s1879_s0, %s1345_s15 }
  0x13   : > { %s238_s23 = scalar_lea.sflag [#allocation4], %s237_s14  ;;  %s1420_s29 = scalar_lea.hbm %s1625_s19, 192 }
  0x14   : > { %s241_s21 = scalar_lea.vmem [#allocation3], %s1344_s16  ;;  %p1421_p1 = scmp.ne.s32.totalorder %s1625_s19, %s1420_s29 }
  0x15   : > { %s249_s22 = sshll.u32 %s241_s21, 4  ;;  %p1422_p2 = pneg %p1627_p12  ;;  %s1632_s22 = int_to_ptr.vmem [resolvable:$true] %s249_s22 }
  0x16   : > { %s1425_s15 = scalar_lea.hbm %s1879_s0, 768  ;;  %p1426_p5 = scmp.lt.u32.totalorder %s1625_s19, %s1879_s0 }
  0x17   : > { %p1423_p3 = pnand %p1422_p2, %p1421_p1  ;;  %p1427_p7 = scmp.lt.u32.totalorder %s1425_s15, %s1420_s29 }
  0x18   : > { %p1429_p9 = scmp.lt.u32.totalorder %s1420_s29, %s1625_s19 }
  0x19   : > { %p1424_p4 = pneg %p1423_p3  ;;  %p1428_p8 = por %p1427_p7, %p1426_p5 }
  0x1b   : > { %p1430_p13 = por %p1429_p9, %p1428_p8 }
  0x1d   : > { %p1431_p0 = pnand %p1430_p13, %p1424_p4 }
  0x1f   : > { %1434 = shalt.err (!%p1431_p0)
}
  0x20   : > { %s1435_s14 = scalar_lea.vmem %s1632_s22, 192  ;;  %s1518_s16 = smov [#allocation3]  }
  0x21   : > { %p1436_p1 = scmp.ne.s32.totalorder %s1632_s22, %s1435_s14  ;;  %s1440_s21 = sshll.u32 %s1518_s16, 4  ;;  %s1441_s21 = int_to_ptr.vmem [resolvable:$false] %s1440_s21 }
  0x22   : > { %s1442_s8 = scalar_lea.vmem %s1441_s21, 384  ;;  %p1443_p10 = scmp.lt.s32.totalorder %s1632_s22, %s1441_s21 }
  0x23   : > { %p1438_p3 = pnand %p1436_p1, %p1422_p2  ;;  %p1444_p5 = scmp.lt.s32.totalorder %s1442_s8, %s1435_s14 }
  0x25   : > { %p1439_p11 = pneg %p1438_p3  ;;  %p1445_p7 = por %p1444_p5, %p1443_p10 }
  0x27   : > { %p1446_p8 = pnand %p1445_p7, %p1439_p11 }
  0x29   : > { %1449 = shalt.err (!%p1446_p8)
}
  0x2a   : > { %1354 = dma.hbm_to_vmem [thread:$0]  (!%p1627_p12), %s1625_s19, 192, %s1632_s22, %s238_s23  }
  0x2b   : > { %p1892_p13 = scmp.lt.s32.totalorder %s1516_s27, 5  ;;  %p1893_p0 = scmp.ge.s32.totalorder %s1516_s27, 1 }
  0x2d   : > { %p255_p2 = pnand %p1893_p0, %p1892_p13 }
  0x2e   : > { %s1665_s29 = sand.u32 (!%p255_p2), 1, %s1508_s25  }
  0x2f   : > { %258 = sbr.rel (%p255_p2) target bundleno = 1108 (0x454), region = 48  ;;  %s261_s15 = scalar_lea.sflag (!%p255_p2), [#allocation4], %s1665_s29 }
  0x30   : > { %s1346_s9 = smul.u32 (!%p255_p2), 12, %s1665_s29 }
  0x32   : > { %s264_s17 = scalar_lea.vmem (!%p255_p2), [#allocation3], %s1346_s9 }
  0x36   : > { %1495 = dma.done.wait (%p1606_p6), %s261_s15, 192  }
  0x37   : > { %1497 = vsyncadd (%p1606_p6), %s261_s15, 4294967104  ;;  %v1673_v0 = vld [vmem:[%s264_s17] sm:$0xff]  ;;  %v1675_v1 = vld [vmem:[%s264_s17 + $0x8] sm:$0xf]  ;;  %v1519_v2 = vmov 0.0|0.0   ;;  %v1520_v4 = vmov 0.0   ;;  %v297_v9 = vlaneseq }
  0x38   : > { %1322 = vmatprep.subr.bf16.mxu1 %v1519_v2  ;;  %v1679_v3 = vcombine.high %v1673_v0, %v1673_v0  ;;  %441 = vmatprep.mubr.f32.mxu0 %v1520_v4  ;;  %vm1521_vm0 = vmmov 0   ;;  %s1522_s11 = smov 127   ;;  %s1523_s19 = smov 1   ;;  %v1524_v7 = vmov 0   ;;  %v358_v8 = vld [vmem:[%s1881_s2] sm:$0xff]  ;;  %vm353_vm3 = vcmask 1043456  }
  0x39   : > { %1299 = vmatprep.mubr.msk.f32.mxu1 %vm1521_vm0, %v1520_v4  ;;  %1410 = vset.pattern.permute.xlu0 %v1524_v7  ;;  %v1697_v10 = vand.u32 127, %v297_v9  ;;  %v350_v18 = vcombine.low %v1675_v1, %v1675_v1  ;;  %v349_v21 = vcombine.low %v1673_v0, %v1673_v0  ;;  %vm1525_vm6 = vmmov 1   ;;  %v357_v36 = vld [vmem:[%s1880_s1] sm:$0xff]  ;;  %s1283_s23 = sshll.u32 %s1588_s28, 7  ;;  %s1179_s21 = scalar_lea.sflag [#allocation5], %s1665_s29 }
  0x3a   : > { %v1405_v5 = vpack.i.bf16 %v1675_v1, %v1679_v3  ;;  %v1400_v6 = vpack.i.bf16 %v1679_v3, %v1673_v0  ;;  %1416 = vset.pattern.permute.xlu1 %v1524_v7  ;;  %vm1317_vm7 = vmpackc.low %vm353_vm3, %vm1525_vm6  ;;  %vm364_vm8 = vcmask 97280   ;;  %v704_v52 = vld [vmem:[%s1885_s6] sm:$0xff]  ;;  %vm558_vm13 = vcmask 195584   ;;  %s1838_s16 = scalar_lea.hbm %s1886_s7, %s1283_s23  ;;  %p1894_p10 = scmp.ne.s32.totalorder %s1889_s12, 0 }
  0x3b   : > { %v1700_v11 = vadd.s32 256, %v1697_v10  ;;  %vm336_vm1 = vcmp.lt.s32.totalorder %v1697_v10, 127  ;;  %vm317_vm2 = vcmp.lt.s32.totalorder %v1697_v10, 1  ;;  %vm301_vm4 = vcmp.gt.s32.totalorder %v1697_v10, 0  ;;  %v552_v53 = vld [vmem:[%s1883_s4] sm:$0xff]  ;;  %s1526_s9 = smov [#allocation6]  }
  0x3c   : > { %1406 = vrot.lane.b32.xlu1 %v1405_v5, %s1522_s11  ;;  %1401 = vrot.lane.b32.xlu0 %v1400_v6, %s1523_s19  ;;  %vm1329_vm12 = vmpackc.low %vm1525_vm6, %vm301_vm4  ;;  %v703_v10 = vld [vmem:[%s1884_s5] sm:$0xff]  ;;  %vm710_vm14 = vcmask 31744   ;;  %s1454_s28 = sshll.u32 %s1526_s9, 4  ;;  %s1455_s28 = int_to_ptr.vmem [resolvable:$false] %s1454_s28 }
  0x3d   : > { %vm306_vm5 = vcmp.lt.s32.totalorder %v1700_v11, 383  ;;  %s1456_s15 = scalar_lea.vmem %s1455_s28, 256 }
  0x40   : > { %330 = vrot.lane.b32.xlu1 %v1673_v0, %s1522_s11  ;;  %315 = vrot.lane.b32.xlu0 %v1675_v1, %s1523_s19 }
  0x44   : > { %361 = vperm.xlu0 %1410, %v358_v8   ;;  %v551_v8 = vld [vmem:[%s1882_s3] sm:$0xff] }
  0xae   : > { %v1407_v12 = vpop.permute.xlu1 %1406  ;;  %v1402_v13 = vpop.permute.xlu0 %1401 }
  0xaf   : > { %v1409_v14 = vunpack.i.h.bf16 %v1407_v12  ;;  %v1408_v15 = vunpack.i.l.bf16 %v1407_v12  ;;  %v1404_v16 = vunpack.i.h.bf16 %v1402_v13  ;;  %v1403_v17 = vunpack.i.l.bf16 %v1402_v13 }
  0xb1   : > { %v319_v19 = vsel %vm317_vm2, %v1403_v17, %v1404_v16  ;;  %v337_v20 = vsel %vm336_vm1, %v1408_v15, %v1409_v14 }
  0xb2   : > { %v331_v22 = vpop.permute.xlu1 %330  ;;  %v316_v23 = vpop.permute.xlu0 %315  ;;  %v355_v24 = vsel %vm353_vm3, %v319_v19, %v1673_v0 }
  0xb3   : > { %v339_v25 = vsel %vm336_vm1, %v1409_v14, %v331_v22  ;;  %v318_v26 = vsel %vm317_vm2, %v1404_v16, %v316_v23  ;;  %v320_v27 = vsel %vm317_vm2, %v316_v23, %v1403_v17  ;;  %v1316_v31 = vpack.c.bf16 %v337_v20, %v355_v24 }
  0xb4   : > { %v348_v28 = vsel %vm306_vm5, %v339_v25, 0.0  ;;  %v327_v29 = vsel %vm301_vm4, %v320_v27, 0.0  ;;  %v356_v30 = vsel %vm353_vm3, %v318_v26, %v350_v18  ;;  %v338_v32 = vsel %vm336_vm1, %v331_v22, %v1408_v15 }
  0xb5   : > { %v1323_v33 = vpack.c.bf16 %v348_v28, %v356_v30  ;;  %v354_v34 = vsel %vm353_vm3, %v327_v29, %v349_v21  ;;  %1318 = vmatprep.subr.msk.bf16.mxu0 %vm1317_vm7, %v1316_v31 }
  0xb6   : > { %v1319_v35 = vpack.c.bf16 %v338_v32, %v354_v34 }
  0xb7   : > { %1325 = vmatpush3.bf16.msk.msra.mxu1 %vm1317_vm7, %v1323_v33 }
  0xb8   : > { %1321 = vmatpush1.bf16.msk.msra.mxu0 %vm1317_vm7, %v1319_v35  ;;  %1331 = vmatprep.subr.bf16.mxu1 %v1519_v2 }
  0xba   : > { %1300 = vmatmul.mubr.msk.f32.vlgmr.msra.gmra.mrb[0].mxu1 %vm364_vm8, %v357_v36 }
  0xbb   : > { %1270 = vmatmul.mubr.msk.f32.vlgmr.msra.gmra.mrb[0].mxu0 %vm364_vm8, %v357_v36  ;;  %1308 = vmatprep.mubr.msk.f32.mxu1 %vm1521_vm0, %v1520_v4 }
  0xbc   : > { %626 = vmatprep.mubr.f32.mxu0 %v1520_v4 }
  0xc3   : > { %v362_v37 = vpop.permute.xlu0 %361 }
 0x18d   : > { %v514_v38 = vpop.f32.mrb[0].mxu1 }
 0x18e   : > { %v443_v39 = vpop.f32.mrb[0].mxu0  ;;  %v1301_v40 = vpop.f32.mrb[1].mxu1  ;;  %v515_v45 = vadd.f32 %v514_v38, %v362_v37 }
 0x18f   : > { %v444_v41 = vadd.f32 %v443_v39, %v362_v37  ;;  %v445_v42 = vpop.f32.mrb[1].mxu0 }
 0x190   : > { %v446_v43 = vadd.f32 %v445_v42, %v362_v37  ;;  %v523_v50 = vmul.f32 0.01, %v515_v45  ;;  %vm520_vm11 = vcmp.ge.f32.partialorder %v515_v45, 0.0 }
 0x191   : > { %vm518_vm9 = vcmp.ge.f32.partialorder %v444_v41, 0.0  ;;  %v521_v44 = vmul.f32 0.01, %v444_v41 }
 0x192   : > { %v522_v46 = vmul.f32 0.01, %v446_v43  ;;  %vm519_vm10 = vcmp.ge.f32.partialorder %v446_v43, 0.0  ;;  %v526_v51 = vsel %vm520_vm11, %v515_v45, %v523_v50 }
 0x193   : > { %v524_v47 = vsel %vm518_vm9, %v444_v41, %v521_v44 }
 0x194   : > { %v525_v48 = vsel %vm519_vm10, %v446_v43, %v522_v46 }
 0x195   : > { %541 = vrot.lane.b32.xlu0 %v525_v48, %s1522_s11  ;;  %v1411_v49 = vpack.i.bf16 %v525_v48, %v524_v47 }
 0x197   : > { %1412 = vrot.lane.b32.xlu1 %v1411_v49, %s1523_s19 }
 0x199   : > { %539 = vrot.lane.b32.xlu0 %v524_v47, %s1522_s11 }
 0x19b   : > { %531 = vrot.lane.b32.xlu1 %v526_v51, %s1523_s19  ;;  %s1267_s19 = sshll.u32 %s1665_s29, 3 }
 0x19c   : > { %s294_s20 = scalar_lea.vmem [#allocation6], %s1267_s19 }
 0x19d   : > { %707 = vperm.xlu0 %1410, %v704_v52   ;;  %s1192_s22 = sshll.u32 %s294_s20, 4  ;;  %s1833_s22 = int_to_ptr.vmem [resolvable:$true] %s1192_s22 }
 0x19e   : > { %s1450_s8 = scalar_lea.vmem %s1833_s22, 128  ;;  %p1457_p4 = scmp.lt.s32.totalorder %s1833_s22, %s1455_s28 }
 0x19f   : > { %543 = vrot.lane.b32.xlu1 %v526_v51, %s1522_s11  ;;  %p1451_p6 = scmp.ne.s32.totalorder %s1833_s22, %s1450_s8  ;;  %p1458_p9 = scmp.lt.s32.totalorder %s1456_s15, %s1450_s8 }
 0x1a1   : > { %p1452_p11 = pnand %p1451_p6, %p1894_p10  ;;  %p1459_p1 = por %p1458_p9, %p1457_p4 }
 0x1a3   : > { %555 = vperm.xlu1 %1416, %v552_v53   ;;  %p1453_p12 = pneg %p1452_p11 }
 0x1a5   : > { %p1460_p3 = pnand %p1459_p1, %p1453_p12 }
 0x207   : > { %v542_v57 = vpop.permute.xlu0 %541 }
 0x209   : > { %v1413_v54 = vpop.permute.xlu1 %1412 }
 0x20a   : > { %v1415_v55 = vunpack.i.h.bf16 %v1413_v54  ;;  %v1414_v56 = vunpack.i.l.bf16 %v1413_v54 }
 0x20b   : > { %v540_v5 = vpop.permute.xlu0 %539 }
 0x20c   : > { %v534_v58 = vsel %vm317_vm2, %v1414_v56, %v1415_v55  ;;  %v546_v9 = vsel %vm336_vm1, %v540_v5, %v542_v57 }
 0x20d   : > { %v532_v59 = vpop.permute.xlu1 %531  ;;  %v1326_v60 = vpack.c.bf16 %v525_v48, %v534_v58 }
 0x20e   : > { %v533_v61 = vsel %vm317_vm2, %v1415_v55, %v532_v59  ;;  %v535_v62 = vsel %vm317_vm2, %v532_v59, %v1414_v56  ;;  %vm969_vm2 = vcmask 64512  }
 0x20f   : > { %v1328_v63 = vpack.c.bf16 %v524_v47, %v535_v62  ;;  %v1332_v2 = vpack.c.bf16 %v526_v51, %v533_v61  ;;  %1327 = vmatprep.subr.bf16.mxu0 %v1326_v60 }
 0x211   : > { %v544_v6 = vpop.permute.xlu1 %543  ;;  %1330 = vmatpush1.bf16.msk.msra.mxu0 %vm1329_vm12, %v1328_v63  ;;  %1333 = vmatpush3.bf16.msra.mxu1 %v1332_v2 }
 0x212   : > { %v545_v7 = vsel %vm336_vm1, %v542_v57, %v544_v6  ;;  %1306 = vmatprep.subr.mxu1 %v1520_v4  ;;  %v547_v12 = vsel %vm336_vm1, %v544_v6, %v540_v5 }
 0x213   : > { %566 = vmatprep.subr.mxu0 %v545_v7 }
 0x215   : > { %567 = vmatpush1.msra.mxu0 %v546_v9  ;;  %1307 = vmatpush3.msk.msra.mxu1 %vm306_vm5, %v547_v12 }
 0x216   : > { %1274 = vmatmul.mubr.msk.f32.vlgmr.msra.gmra.mrb[2].mxu0 %vm558_vm13, %v551_v8  ;;  %1309 = vmatmul.mubr.msk.f32.vlgmr.msra.gmra.mrb[2].mxu1 %vm558_vm13, %v551_v8 }
 0x217   : > { %1277 = vmatprep.subr.msk.mxu0 %vm353_vm3, %v1679_v3  ;;  %1311 = vmatprep.subr.mxu1 %v1520_v4 }
 0x218   : > { %1278 = vmatpush1.msk.msra.mxu0 %vm353_vm3, %v1673_v0  ;;  %784 = vmatprep.mubr.f32.mxu0 %v1520_v4 }
 0x219   : > { %1312 = vmatpush3.msk.msra.mxu1 %vm353_vm3, %v1675_v1  ;;  %1313 = vmatprep.mubr.msk.f32.mxu1 %vm1521_vm0, %v1520_v4 }
 0x21c   : > { %v708_v11 = vpop.permute.xlu0 %707 }
 0x21e   : > { %1279 = vmatmul.mubr.msk.f32.vlgmr.msra.gmra.mrb[2].mxu0 %vm710_vm14, %v703_v10  ;;  %1314 = vmatmul.mubr.msk.f32.vlgmr.msra.gmra.mrb[2].mxu1 %vm710_vm14, %v703_v10 }
 0x222   : > { %v556_v3 = vpop.permute.xlu1 %555 }
 0x223   : > { %v1334_v13 = vadd.f32 %v708_v11, %v556_v3 }
 0x2f1   : > { %v786_v14 = vpop.f32.mrb[2].mxu0  ;;  %v857_v0 = vpop.f32.mrb[2].mxu1 }
 0x2f2   : > { %v1335_v15 = vadd.f32 %v1334_v13, %v786_v14  ;;  %v788_v16 = vpop.f32.mrb[3].mxu0  ;;  %v1315_v17 = vpop.f32.mrb[3].mxu1  ;;  %v1339_v21 = vadd.f32 %v1334_v13, %v857_v0 }
 0x2f3   : > { %v1337_v18 = vadd.f32 %v1334_v13, %v788_v16 }
 0x2f4   : > { %v867_v1 = vmul.f32 0.01, %v1335_v15  ;;  %vm864_vm15 = vcmp.ge.f32.partialorder %v1335_v15, 0.0  ;;  %v869_v22 = vmul.f32 0.01, %v1339_v21  ;;  %vm866_vm1 = vcmp.ge.f32.partialorder %v1339_v21, 0.0 }
 0x2f5   : > { %v868_v19 = vmul.f32 0.01, %v1337_v18  ;;  %vm865_vm0 = vcmp.ge.f32.partialorder %v1337_v18, 0.0 }
 0x2f6   : > { %v870_v4 = vsel %vm864_vm15, %v1335_v15, %v867_v1  ;;  %v872_v23 = vsel %vm866_vm1, %v1339_v21, %v869_v22 }
 0x2f7   : > { %873 = vxpose.xlu1.b32.start.end [1/1] (short) %v870_v4, 128  ;;  %v871_v20 = vsel %vm865_vm0, %v1337_v18, %v868_v19 }
 0x2f8   : > { %905 = vxpose.xlu0.b32.start.end [1/1] (short) %v871_v20, 128 }
 0x335   : > { %937 = vxpose.xlu0.b32.start.end [1/1] (short) %v872_v23, 128 }
 0x377   : > { %v889_v24 = vpop.trf.xlu1 }
 0x378   : > { %970 = vst.msk [vmem:[#allocation2] sm:$0xff] %vm969_vm2, %v889_v24  ;;  %v921_v25 = vpop.trf.xlu0 }
 0x379   : > { %986 = vst.msk [vmem:[#allocation2 + $0x80] sm:$0xff] %vm969_vm2, %v921_v25 }
 0x37b   : > { %v890_v26 = vpop.trf.xlu1 }
 0x37c   : > { %971 = vst.msk [vmem:[#allocation2 + $0x8] sm:$0xff] %vm969_vm2, %v890_v26  ;;  %v922_v27 = vpop.trf.xlu0 }
 0x37d   : > { %987 = vst.msk [vmem:[#allocation2 + $0x88] sm:$0xff] %vm969_vm2, %v922_v27 }
 0x37f   : > { %v891_v28 = vpop.trf.xlu1 }
 0x380   : > { %972 = vst.msk [vmem:[#allocation2 + $0x10] sm:$0xff] %vm969_vm2, %v891_v28  ;;  %v923_v29 = vpop.trf.xlu0 }
 0x381   : > { %988 = vst.msk [vmem:[#allocation2 + $0x90] sm:$0xff] %vm969_vm2, %v923_v29 }
 0x383   : > { %v892_v30 = vpop.trf.xlu1 }
 0x384   : > { %973 = vst.msk [vmem:[#allocation2 + $0x18] sm:$0xff] %vm969_vm2, %v892_v30  ;;  %v924_v31 = vpop.trf.xlu0 }
 0x385   : > { %989 = vst.msk [vmem:[#allocation2 + $0x98] sm:$0xff] %vm969_vm2, %v924_v31 }
 0x387   : > { %v893_v32 = vpop.trf.xlu1  ;;  %v1018_v33 = vld [vmem:[#allocation2] ss:$3 sm:$0xff]  ;;  %v1050_v34 = vld [vmem:[#allocation2 + $0x1] ss:$3 sm:$0xff]  ;;  %v1082_v35 = vld [vmem:[#allocation2 + $0x2] ss:$3 sm:$0xff] }
 0x388   : > { %974 = vst.msk [vmem:[#allocation2 + $0x20] sm:$0xff] %vm969_vm2, %v893_v32  ;;  %v925_v36 = vpop.trf.xlu0  ;;  %v1113_v37 = vmax.f32 %v1018_v33, %v1050_v34 }
 0x389   : > { %990 = vst.msk [vmem:[#allocation2 + $0xa0] sm:$0xff] %vm969_vm2, %v925_v36 }
 0x38a   : > { %v1129_v38 = vmax.f32 %v1113_v37, %v1082_v35 }
 0x38b   : > { %v894_v39 = vpop.trf.xlu1 }
 0x38c   : > { %975 = vst.msk [vmem:[#allocation2 + $0x28] sm:$0xff] %vm969_vm2, %v894_v39  ;;  %v926_v40 = vpop.trf.xlu0  ;;  %1145 = vxpose.xlu1.b32.start [1/16] (narrow) %v1129_v38, 8 }
 0x38d   : > { %991 = vst.msk [vmem:[#allocation2 + $0xa8] sm:$0xff] %vm969_vm2, %v926_v40 }
 0x38f   : > { %v895_v41 = vpop.trf.xlu1 }
 0x390   : > { %976 = vst.msk [vmem:[#allocation2 + $0x30] sm:$0xff] %vm969_vm2, %v895_v41  ;;  %v927_v42 = vpop.trf.xlu0  ;;  %v1030_v19 = vld [vmem:[#allocation2 + $0x90] ss:$3 sm:$0xff]  ;;  %v1062_v21 = vld [vmem:[#allocation2 + $0x91] ss:$3 sm:$0xff] }
 0x391   : > { %992 = vst.msk [vmem:[#allocation2 + $0xb0] sm:$0xff] %vm969_vm2, %v927_v42  ;;  %v1119_v26 = vmax.f32 %v1030_v19, %v1062_v21  ;;  %v1094_v30 = vld [vmem:[#allocation2 + $0x92] ss:$3 sm:$0xff] }
 0x393   : > { %v896_v43 = vpop.trf.xlu1  ;;  %v1020_v44 = vld [vmem:[#allocation2 + $0x18] ss:$3 sm:$0xff]  ;;  %v1052_v45 = vld [vmem:[#allocation2 + $0x19] ss:$3 sm:$0xff]  ;;  %v1084_v46 = vld [vmem:[#allocation2 + $0x1a] ss:$3 sm:$0xff]  ;;  %v1135_v31 = vmax.f32 %v1119_v26, %v1094_v30 }
 0x394   : > { %977 = vst.msk [vmem:[#allocation2 + $0x38] sm:$0xff] %vm969_vm2, %v896_v43  ;;  %v928_v47 = vpop.trf.xlu0  ;;  %v1114_v48 = vmax.f32 %v1020_v44, %v1052_v45 }
 0x395   : > { %993 = vst.msk [vmem:[#allocation2 + $0xb8] sm:$0xff] %vm969_vm2, %v928_v47 }
 0x396   : > { %v1130_v49 = vmax.f32 %v1114_v48, %v1084_v46 }
 0x397   : > { %v897_v50 = vpop.trf.xlu1 }
 0x398   : > { %978 = vst.msk [vmem:[#allocation2 + $0x40] sm:$0xff] %vm969_vm2, %v897_v50  ;;  %v929_v51 = vpop.trf.xlu0  ;;  %1146 = vxpose.xlu1.b32.cont [2/16] (narrow) %v1130_v49, 8 }
 0x399   : > { %994 = vst.msk [vmem:[#allocation2 + $0xc0] sm:$0xff] %vm969_vm2, %v929_v51 }
 0x39b   : > { %v898_v52 = vpop.trf.xlu1 }
 0x39c   : > { %979 = vst.msk [vmem:[#allocation2 + $0x48] sm:$0xff] %vm969_vm2, %v898_v52  ;;  %v930_v53 = vpop.trf.xlu0  ;;  %v1032_v27 = vld [vmem:[#allocation2 + $0xa8] ss:$3 sm:$0xff]  ;;  %v1064_v28 = vld [vmem:[#allocation2 + $0xa9] ss:$3 sm:$0xff] }
 0x39d   : > { %995 = vst.msk [vmem:[#allocation2 + $0xc8] sm:$0xff] %vm969_vm2, %v930_v53  ;;  %v1120_v32 = vmax.f32 %v1032_v27, %v1064_v28  ;;  %v1096_v36 = vld [vmem:[#allocation2 + $0xaa] ss:$3 sm:$0xff] }
 0x39f   : > { %v899_v54 = vpop.trf.xlu1  ;;  %v1022_v55 = vld [vmem:[#allocation2 + $0x30] ss:$3 sm:$0xff]  ;;  %v1054_v56 = vld [vmem:[#allocation2 + $0x31] ss:$3 sm:$0xff]  ;;  %v1086_v57 = vld [vmem:[#allocation2 + $0x32] ss:$3 sm:$0xff]  ;;  %v1136_v37 = vmax.f32 %v1120_v32, %v1096_v36 }
 0x3a0   : > { %980 = vst.msk [vmem:[#allocation2 + $0x50] sm:$0xff] %vm969_vm2, %v899_v54  ;;  %v931_v58 = vpop.trf.xlu0  ;;  %v1115_v59 = vmax.f32 %v1022_v55, %v1054_v56 }
 0x3a1   : > { %996 = vst.msk [vmem:[#allocation2 + $0xd0] sm:$0xff] %vm969_vm2, %v931_v58 }
 0x3a2   : > { %v1131_v60 = vmax.f32 %v1115_v59, %v1086_v57 }
 0x3a3   : > { %v900_v61 = vpop.trf.xlu1 }
 0x3a4   : > { %981 = vst.msk [vmem:[#allocation2 + $0x58] sm:$0xff] %vm969_vm2, %v900_v61  ;;  %v932_v62 = vpop.trf.xlu0  ;;  %1147 = vxpose.xlu1.b32.cont [3/16] (narrow) %v1131_v60, 8 }
 0x3a5   : > { %997 = vst.msk [vmem:[#allocation2 + $0xd8] sm:$0xff] %vm969_vm2, %v932_v62 }
 0x3a7   : > { %v901_v63 = vpop.trf.xlu1 }
 0x3a8   : > { %982 = vst.msk [vmem:[#allocation2 + $0x60] sm:$0xff] %vm969_vm2, %v901_v63  ;;  %v933_v2 = vpop.trf.xlu0  ;;  %v1034_v33 = vld [vmem:[#allocation2 + $0xc0] ss:$3 sm:$0xff]  ;;  %v1066_v34 = vld [vmem:[#allocation2 + $0xc1] ss:$3 sm:$0xff] }
 0x3a9   : > { %998 = vst.msk [vmem:[#allocation2 + $0xe0] sm:$0xff] %vm969_vm2, %v933_v2  ;;  %v1121_v38 = vmax.f32 %v1034_v33, %v1066_v34  ;;  %v1098_v42 = vld [vmem:[#allocation2 + $0xc2] ss:$3 sm:$0xff] }
 0x3ab   : > { %v902_v5 = vpop.trf.xlu1  ;;  %v1024_v6 = vld [vmem:[#allocation2 + $0x48] ss:$3 sm:$0xff]  ;;  %v1056_v7 = vld [vmem:[#allocation2 + $0x49] ss:$3 sm:$0xff]  ;;  %v1088_v8 = vld [vmem:[#allocation2 + $0x4a] ss:$3 sm:$0xff]  ;;  %v1137_v43 = vmax.f32 %v1121_v38, %v1098_v42 }
 0x3ac   : > { %983 = vst.msk [vmem:[#allocation2 + $0x68] sm:$0xff] %vm969_vm2, %v902_v5  ;;  %v934_v9 = vpop.trf.xlu0  ;;  %v1116_v12 = vmax.f32 %v1024_v6, %v1056_v7 }
 0x3ad   : > { %999 = vst.msk [vmem:[#allocation2 + $0xe8] sm:$0xff] %vm969_vm2, %v934_v9 }
 0x3ae   : > { %v1132_v10 = vmax.f32 %v1116_v12, %v1088_v8 }
 0x3af   : > { %v903_v3 = vpop.trf.xlu1 }
 0x3b0   : > { %984 = vst.msk [vmem:[#allocation2 + $0x70] sm:$0xff] %vm969_vm2, %v903_v3  ;;  %v935_v11 = vpop.trf.xlu0  ;;  %1148 = vxpose.xlu1.b32.cont [4/16] (narrow) %v1132_v10, 8 }
 0x3b1   : > { %1000 = vst.msk [vmem:[#allocation2 + $0xf0] sm:$0xff] %vm969_vm2, %v935_v11 }
 0x3b3   : > { %v904_v13 = vpop.trf.xlu1 }
 0x3b4   : > { %985 = vst.msk [vmem:[#allocation2 + $0x78] sm:$0xff] %vm969_vm2, %v904_v13  ;;  %v936_v14 = vpop.trf.xlu0  ;;  %v1036_v39 = vld [vmem:[#allocation2 + $0xd8] ss:$3 sm:$0xff]  ;;  %v1068_v40 = vld [vmem:[#allocation2 + $0xd9] ss:$3 sm:$0xff] }
 0x3b5   : > { %1001 = vst.msk [vmem:[#allocation2 + $0xf8] sm:$0xff] %vm969_vm2, %v936_v14  ;;  %v1122_v44 = vmax.f32 %v1036_v39, %v1068_v40  ;;  %v1100_v48 = vld [vmem:[#allocation2 + $0xda] ss:$3 sm:$0xff] }
 0x3b7   : > { %v1026_v0 = vld [vmem:[#allocation2 + $0x60] ss:$3 sm:$0xff]  ;;  %v1058_v15 = vld [vmem:[#allocation2 + $0x61] ss:$3 sm:$0xff]  ;;  %v1090_v16 = vld [vmem:[#allocation2 + $0x62] ss:$3 sm:$0xff]  ;;  %v1138_v49 = vmax.f32 %v1122_v44, %v1100_v48 }
 0x3b8   : > { %v953_v17 = vpop.trf.xlu0  ;;  %v1117_v18 = vmax.f32 %v1026_v0, %v1058_v15 }
 0x3b9   : > { %1002 = vst.msk [vmem:[#allocation2 + $0x100] sm:$0xff] %vm969_vm2, %v953_v17 }
 0x3ba   : > { %v1133_v1 = vmax.f32 %v1117_v18, %v1090_v16 }
 0x3bb   : > { %v1028_v4 = vld [vmem:[#allocation2 + $0x78] ss:$3 sm:$0xff]  ;;  %v1060_v20 = vld [vmem:[#allocation2 + $0x79] ss:$3 sm:$0xff]  ;;  %v1092_v24 = vld [vmem:[#allocation2 + $0x7a] ss:$3 sm:$0xff] }
 0x3bc   : > { %1149 = vxpose.xlu1.b32.cont [5/16] (narrow) %v1133_v1, 8  ;;  %v954_v22 = vpop.trf.xlu0  ;;  %v1118_v23 = vmax.f32 %v1028_v4, %v1060_v20 }
 0x3bd   : > { %1003 = vst.msk [vmem:[#allocation2 + $0x108] sm:$0xff] %vm969_vm2, %v954_v22 }
 0x3be   : > { %v1134_v25 = vmax.f32 %v1118_v23, %v1092_v24 }
 0x3c0   : > { %1150 = vxpose.xlu1.b32.cont [6/16] (narrow) %v1134_v25, 8  ;;  %v955_v29 = vpop.trf.xlu0  ;;  %v1038_v45 = vld [vmem:[#allocation2 + $0xf0] ss:$3 sm:$0xff]  ;;  %v1070_v46 = vld [vmem:[#allocation2 + $0xf1] ss:$3 sm:$0xff] }
 0x3c1   : > { %1004 = vst.msk [vmem:[#allocation2 + $0x110] sm:$0xff] %vm969_vm2, %v955_v29  ;;  %v1123_v50 = vmax.f32 %v1038_v45, %v1070_v46  ;;  %v1102_v54 = vld [vmem:[#allocation2 + $0xf2] ss:$3 sm:$0xff] }
 0x3c3   : > { %v1139_v55 = vmax.f32 %v1123_v50, %v1102_v54 }
 0x3c4   : > { %1151 = vxpose.xlu1.b32.cont [7/16] (narrow) %v1135_v31, 8  ;;  %v956_v35 = vpop.trf.xlu0 }
 0x3c5   : > { %1005 = vst.msk [vmem:[#allocation2 + $0x118] sm:$0xff] %vm969_vm2, %v956_v35 }
 0x3c8   : > { %1152 = vxpose.xlu1.b32.cont [8/16] (narrow) %v1136_v37, 8  ;;  %v957_v41 = vpop.trf.xlu0 }
 0x3c9   : > { %1006 = vst.msk [vmem:[#allocation2 + $0x120] sm:$0xff] %vm969_vm2, %v957_v41 }
 0x3cc   : > { %1153 = vxpose.xlu1.b32.cont [9/16] (narrow) %v1137_v43, 8  ;;  %v958_v47 = vpop.trf.xlu0  ;;  %v1040_v51 = vld [vmem:[#allocation2 + $0x108] ss:$3 sm:$0xff]  ;;  %v1072_v52 = vld [vmem:[#allocation2 + $0x109] ss:$3 sm:$0xff] }
 0x3cd   : > { %1007 = vst.msk [vmem:[#allocation2 + $0x128] sm:$0xff] %vm969_vm2, %v958_v47  ;;  %v1124_v56 = vmax.f32 %v1040_v51, %v1072_v52  ;;  %v1104_v58 = vld [vmem:[#allocation2 + $0x10a] ss:$3 sm:$0xff] }
 0x3cf   : > { %v1140_v59 = vmax.f32 %v1124_v56, %v1104_v58 }
 0x3d0   : > { %1154 = vxpose.xlu1.b32.cont [10/16] (narrow) %v1138_v49, 8  ;;  %v959_v53 = vpop.trf.xlu0 }
 0x3d1   : > { %1008 = vst.msk [vmem:[#allocation2 + $0x130] sm:$0xff] %vm969_vm2, %v959_v53 }
 0x3d4   : > { %1155 = vxpose.xlu1.b32.cont [11/16] (narrow) %v1139_v55, 8  ;;  %v960_v57 = vpop.trf.xlu0 }
 0x3d5   : > { %1009 = vst.msk [vmem:[#allocation2 + $0x138] sm:$0xff] %vm969_vm2, %v960_v57 }
 0x3d8   : > { %1156 = vxpose.xlu1.b32.cont [12/16] (narrow) %v1140_v59, 8  ;;  %v961_v60 = vpop.trf.xlu0  ;;  %v1042_v61 = vld [vmem:[#allocation2 + $0x120] ss:$3 sm:$0xff]  ;;  %v1074_v62 = vld [vmem:[#allocation2 + $0x121] ss:$3 sm:$0xff] }
 0x3d9   : > { %1010 = vst.msk [vmem:[#allocation2 + $0x140] sm:$0xff] %vm969_vm2, %v961_v60  ;;  %v1125_v63 = vmax.f32 %v1042_v61, %v1074_v62  ;;  %v1106_v2 = vld [vmem:[#allocation2 + $0x122] ss:$3 sm:$0xff] }
 0x3db   : > { %v1141_v5 = vmax.f32 %v1125_v63, %v1106_v2 }
 0x3dc   : > { %v962_v6 = vpop.trf.xlu0 }
 0x3dd   : > { %1011 = vst.msk [vmem:[#allocation2 + $0x148] sm:$0xff] %vm969_vm2, %v962_v6  ;;  %1157 = vxpose.xlu1.b32.cont [13/16] (narrow) %v1141_v5, 8 }
 0x3e0   : > { %v963_v7 = vpop.trf.xlu0 }
 0x3e1   : > { %1012 = vst.msk [vmem:[#allocation2 + $0x150] sm:$0xff] %vm969_vm2, %v963_v7 }
 0x3e4   : > { %v964_v8 = vpop.trf.xlu0  ;;  %v1044_v9 = vld [vmem:[#allocation2 + $0x138] ss:$3 sm:$0xff]  ;;  %v1076_v12 = vld [vmem:[#allocation2 + $0x139] ss:$3 sm:$0xff]  ;;  %v1108_v3 = vld [vmem:[#allocation2 + $0x13a] ss:$3 sm:$0xff] }
 0x3e5   : > { %1013 = vst.msk [vmem:[#allocation2 + $0x158] sm:$0xff] %vm969_vm2, %v964_v8  ;;  %v1126_v10 = vmax.f32 %v1044_v9, %v1076_v12 }
 0x3e7   : > { %v1142_v11 = vmax.f32 %v1126_v10, %v1108_v3 }
 0x3e8   : > { %v965_v13 = vpop.trf.xlu0 }
 0x3e9   : > { %1014 = vst.msk [vmem:[#allocation2 + $0x160] sm:$0xff] %vm969_vm2, %v965_v13  ;;  %1158 = vxpose.xlu1.b32.cont [14/16] (narrow) %v1142_v11, 8 }
 0x3ec   : > { %v966_v14 = vpop.trf.xlu0 }
 0x3ed   : > { %1015 = vst.msk [vmem:[#allocation2 + $0x168] sm:$0xff] %vm969_vm2, %v966_v14 }
 0x3f0   : > { %v967_v0 = vpop.trf.xlu0  ;;  %v1046_v15 = vld [vmem:[#allocation2 + $0x150] ss:$3 sm:$0xff]  ;;  %v1078_v16 = vld [vmem:[#allocation2 + $0x151] ss:$3 sm:$0xff]  ;;  %v1110_v18 = vld [vmem:[#allocation2 + $0x152] ss:$3 sm:$0xff] }
 0x3f1   : > { %1016 = vst.msk [vmem:[#allocation2 + $0x170] sm:$0xff] %vm969_vm2, %v967_v0  ;;  %v1127_v17 = vmax.f32 %v1046_v15, %v1078_v16 }
 0x3f3   : > { %v1143_v1 = vmax.f32 %v1127_v17, %v1110_v18 }
 0x3f4   : > { %v968_v19 = vpop.trf.xlu0 }
 0x3f5   : > { %1017 = vst.msk [vmem:[#allocation2 + $0x178] sm:$0xff] %vm969_vm2, %v968_v19  ;;  %1159 = vxpose.xlu1.b32.cont [15/16] (narrow) %v1143_v1, 8 }
 0x3fc   : > { %v1048_v4 = vld [vmem:[#allocation2 + $0x168] ss:$3 sm:$0xff]  ;;  %v1080_v20 = vld [vmem:[#allocation2 + $0x169] ss:$3 sm:$0xff]  ;;  %v1112_v22 = vld [vmem:[#allocation2 + $0x16a] ss:$3 sm:$0xff] }
 0x3fd   : > { %v1128_v21 = vmax.f32 %v1048_v4, %v1080_v20 }
 0x3ff   : > { %v1144_v23 = vmax.f32 %v1128_v21, %v1112_v22 }
 0x401   : > { %1160 = vxpose.xlu1.b32.end [16/16] (narrow) %v1144_v23, 8 }
 0x445   : > { %v1161_v24 = vpop.trf.xlu1 }
 0x446   : > { %1177 = vst [vmem:[%s294_s20] sm:$0xff] %v1161_v24 }
 0x447   : > { %1463 = shalt.err (!%p1460_p3)
}
 0x448   : > { %s1464_s29 = scalar_lea.hbm %s1838_s16, 128  ;;  %s1468_s19 = scalar_lea.hbm %s1886_s7, 512 }
 0x449   : > { %p1465_p5 = scmp.ne.s32.totalorder %s1838_s16, %s1464_s29  ;;  %p1469_p13 = scmp.lt.u32.totalorder %s1838_s16, %s1886_s7 }
 0x44a   : > { %p1470_p0 = scmp.lt.u32.totalorder %s1468_s19, %s1464_s29  ;;  %p1472_p6 = scmp.lt.u32.totalorder %s1464_s29, %s1838_s16 }
 0x44b   : > { %p1466_p7 = pnand %p1465_p5, %p1894_p10 }
 0x44c   : > { %p1471_p2 = por %p1470_p0, %p1469_p13 }
 0x44d   : > { %p1467_p8 = pneg %p1466_p7 }
 0x44e   : > { %p1473_p11 = por %p1472_p6, %p1471_p2 }
 0x450   : > { %p1474_p12 = pnand %p1473_p11, %p1467_p8 }
 0x452   : > { %1477 = shalt.err (!%p1474_p12)
}
 0x453   : > { %1349 = dma.vmem_to_hbm [thread:$0]  (%p1894_p10), %s1833_s22, 128, %s1838_s16, %s1179_s21  }
 0x454 PF: > { %p1360_p4 = scmp.ge.s32.totalorder %s1516_s27, 2  ;;  %s1204_s18 = sand.u32 1, %s1504_s24  }
 0x455   : > { %p1895_p9 = scmp.ne.s32.totalorder %s1890_s13, 0  ;;  %s1205_s14 = scalar_lea.sflag [#allocation5], %s1204_s18 }
 0x457   : > { %p1356_p1 = pnand %p1360_p4, %p1895_p9 }
 0x459   : > { %1499 = dma.done.wait (!%p1356_p1), %s1205_s14, 128  }
 0x45a   : > { %1501 = vsyncadd (!%p1356_p1), %s1205_s14, 4294967168  ;;  %p20_p3 = scmp.ge.s32.totalorder %s1592_s30, 6   ;;  %s1896_s24 = smov %s1508_s25 }
 0x45b   : > { %s1897_s25 = smov %s1512_s26  ;;  %s1898_s26 = smov %s1604_s10 }
 0x45c   : > { %s1899_s27 = smov %s1592_s30  ;;  %22 = sbr.rel (!%p20_p3) target bundleno = 5 (0x5), region = 140 }
 0x463   :  { %1210 = vsyncpa [#allocation4], 1 }
 0x464   :  { %1212 = vsyncpa [#allocation4 + $0x1], 1 }
 0x465   :  { %1213 = vsyncpa [#allocation5], 1 }
 0x466   :  { %1215 = vsyncpa [#allocation5 + $0x1], 1 }

</bundles_post_ra>
